<compile_context>
chip_gen: v7x
topology: tpu7x:2x2x1
jax: 0.10.0
libtpu: 0.0.40
codegen_flags: <defaults>
</compile_context>

<pallas_src>
import math
from functools import partial

import jax
import jax.numpy as jnp
from jax import lax
from jax.experimental import pallas as pl
from jax.experimental.pallas import tpu as pltpu


# ----------------- Fused kernel: per-(batch, head) QKV proj + flash causal SDPA -----------------
def fused_mha_kernel(x_ref, w_ref, b_ref, o_ref, q_sc, k_sc, v_sc, *, block_q):
    """One (batch b, head h) grid step.

    x_ref : (S, D)     current batch's activations
    w_ref : (3, D, Dh) this head's [q; k; v] projection slabs (q slab pre-scaled by 1/sqrt(Dh))
    b_ref : (3, 1, Dh) this head's biases (q slab pre-scaled)
    o_ref : (S, Dh)    this head's context output
    q_sc/k_sc/v_sc : (S, Dh) VMEM scratch holding the projected activations
    """
    S, _ = x_ref.shape
    Dh = q_sc.shape[-1]
    T = block_q
    nq = S // T

    x = x_ref[...]
    # Per-head QKV projection: contraction depth = D (keeps the MXU K-dim full even for small Dh);
    # f32 accumulate, activations stored back in the input dtype. Scale already folded into w/b.
    q_sc[...] = (jnp.dot(x, w_ref[0], preferred_element_type=jnp.float32) + b_ref[0]).astype(x.dtype)
    k_sc[...] = (jnp.dot(x, w_ref[1], preferred_element_type=jnp.float32) + b_ref[1]).astype(x.dtype)
    v_sc[...] = (jnp.dot(x, w_ref[2], preferred_element_type=jnp.float32) + b_ref[2]).astype(x.dtype)

    # Block-local causal mask; identical for every diagonal block (Tq == Tkv) -> built once.
    row = lax.broadcasted_iota(jnp.int32, (T, T), 0)
    col = lax.broadcasted_iota(jnp.int32, (T, T), 1)
    diag_mask = col <= row

    @pl.loop(0, nq)
    def _q_block(qi):
        q0 = pl.multiple_of(qi * T, T)
        q_blk = q_sc[pl.ds(q0, T), :]                                    # (T, Dh)

        def attend(ki, carry, masked):
            m_prev, l_prev, acc_prev = carry
            kv0 = pl.multiple_of(ki * T, T)
            k_blk = k_sc[pl.ds(kv0, T), :]
            v_blk = v_sc[pl.ds(kv0, T), :]
            # scores: contract the last dims of q and k (no explicit k transpose), f32 accumulate
            s = lax.dot_general(q_blk, k_blk, (((1,), (1,)), ((), ())),
                                preferred_element_type=jnp.float32)      # (T, T) f32
            if masked:  # only the diagonal block pays for the causal select
                s = jnp.where(diag_mask, s, -jnp.inf)
            m_cur = jnp.maximum(m_prev, jnp.max(s, axis=-1, keepdims=True))
            alpha = jnp.exp(m_prev - m_cur)
            p = jnp.exp(s - m_cur)
            l_cur = alpha * l_prev + jnp.sum(p, axis=-1, keepdims=True)
            acc_cur = alpha * acc_prev + lax.dot_general(
                p.astype(v_blk.dtype), v_blk, (((1,), (0,)), ((), ())),
                preferred_element_type=jnp.float32)                      # (T, Dh) f32
            return m_cur, l_cur, acc_cur

        init = (jnp.full((T, 1), -jnp.inf, dtype=jnp.float32),
                jnp.zeros((T, 1), dtype=jnp.float32),
                jnp.zeros((T, Dh), dtype=jnp.float32))
        # Causal block skipping: only blocks strictly below the diagonal, unmasked ...
        carry = lax.fori_loop(0, qi, lambda ki, c: attend(ki, c, False), init)
        # ... plus the diagonal block, with the causal select.
        _, l, acc = attend(qi, carry, True)

        # Exact normalization (off the MXU critical path; strict parity with torch softmax).
        o_ref[pl.ds(q0, T), :] = (acc / l).astype(o_ref.dtype)


# -------------------- One-time weight repack (call at weight-load time, not per step) -----------
def prepare_qkv_params(w_qkv, b_qkv, n_heads):
    """torch layout: qkv = nn.Linear(D, 3D); the module views its output as (..., H, 3, Dh),
    i.e. output-column index c = h*3*Dh + t*Dh + d (t in {q, k, v}).  Repack into per-head slabs
    (H, 3, D, Dh) / (H, 3, 1, Dh) and fold the 1/sqrt(Dh) softmax scale into the q slab.

    w_qkv: (D, 3D) == torch qkv.weight.T ;  b_qkv: (3D,)
    """
    D = w_qkv.shape[0]
    H = n_heads
    Dh = D // H
    scale = 1.0 / math.sqrt(Dh)
    w_p = jnp.asarray(w_qkv).reshape(D, H, 3, Dh).transpose(1, 2, 0, 3)   # (H, 3, D, Dh)
    b_p = jnp.asarray(b_qkv).reshape(H, 3, Dh)[:, :, None, :]             # (H, 3, 1, Dh)
    w_p = w_p.at[:, 0].multiply(scale)
    b_p = b_p.at[:, 0].multiply(scale)
    return w_p, b_p


# ---------------------------------------------- Wrapper -----------------------------------------
@partial(jax.jit, static_argnames=("block_q",))
def multihead_attention(x, w_p, b_p, *, block_q=128):
    """x: (B, S, D); w_p/b_p from prepare_qkv_params.  Returns (B, S, D) causal MHA output."""
    B, S, D = x.shape
    H, _, _, Dh = w_p.shape
    T = min(block_q, S)
    assert S % T == 0, "S must be a multiple of the q/kv block size"

    ctx = pl.pallas_call(
        partial(fused_mha_kernel, block_q=T),
        out_shape=jax.ShapeDtypeStruct((B, H, S, Dh), x.dtype),
        grid=(B, H),
        in_specs=[
            # x[b]: same block index across h -> DMA'd once per batch, reused for every head.
            pl.BlockSpec((None, S, D), lambda b, h: (b, 0, 0)),
            # only the current head's (D, 3*Dh) weight slab is resident (not the full (D, 3D)).
            pl.BlockSpec((None, 3, D, Dh), lambda b, h: (h, 0, 0, 0)),
            pl.BlockSpec((None, 3, 1, Dh), lambda b, h: (h, 0, 0, 0)),
        ],
        out_specs=pl.BlockSpec((None, None, S, Dh), lambda b, h: (b, h, 0, 0)),
        scratch_shapes=[
            pltpu.VMEM((S, Dh), x.dtype),   # q (pre-scaled)
            pltpu.VMEM((S, Dh), x.dtype),   # k
            pltpu.VMEM((S, Dh), x.dtype),   # v
        ],
        compiler_params=pltpu.CompilerParams(
            # Both axes are independent (KV tiling is an in-kernel loop, so no "arbitrary" axis
            # is needed): B*H parallel steps -> megacore sharding + pipelining slack on v7x.
            dimension_semantics=("parallel", "parallel"),
        ),
    )(x, w_p, b_p)

    # Head merge == torch's context.transpose(1, 2).contiguous().view(B, S, D).
    return ctx.transpose(0, 2, 1, 3).reshape(B, S, D)


# ------------------------------------------ pure-JAX reference ----------------------------------
def reference(x, w_qkv, b_qkv, n_heads):
    B, S, D = x.shape
    H = n_heads
    Dh = D // H
    qkv = x.reshape(B * S, D) @ w_qkv + b_qkv
    qkv = qkv.reshape(B, S, H, 3, Dh)
    qkv = jnp.transpose(qkv, (0, 2, 3, 1, 4))                 # (B, H, 3, S, Dh)
    q, k, v = qkv[:, :, 0], qkv[:, :, 1], qkv[:, :, 2]
    s = jnp.einsum("bhqd,bhkd->bhqk", q, k) / math.sqrt(Dh)
    mask = jnp.tril(jnp.ones((S, S), dtype=bool))
    s = jnp.where(mask, s, -jnp.inf)
    p = jax.nn.softmax(s, axis=-1)
    ctx = jnp.einsum("bhqk,bhkd->bhqd", p, v)
    return jnp.transpose(ctx, (0, 2, 1, 3)).reshape(B, S, D)


if __name__ == "__main__":
    # cfg: n_dim=32, n_heads=4, bias=True, dropout=0.0
    B, S, D, H = 2, 16, 32, 4

    key = jax.random.PRNGKey(0)
    kx, kw, kb = jax.random.split(key, 3)

    x = jax.random.normal(kx, (B, S, D), dtype=jnp.float32)

    # deterministic init mimicking nn.Linear default: U(-1/sqrt(D), 1/sqrt(D))
    bound = 1.0 / math.sqrt(D)
    w_qkv = jax.random.uniform(kw, (D, 3 * D), dtype=jnp.float32, minval=-bound, maxval=bound)
    b_qkv = jax.random.uniform(kb, (3 * D,), dtype=jnp.float32, minval=-bound, maxval=bound)

    # One-time weight repack (weight-load time), then the per-call fast path.
    w_p, b_p = prepare_qkv_params(w_qkv, b_qkv, H)

    out = multihead_attention(x, w_p, b_p)
    out = jax.block_until_ready(out)

    ref = reference(x, w_qkv, b_qkv, H)
    assert out.shape == (B, S, D)
    # exact softmax normalization now (no approx reciprocal); tolerance covers f32 matmul rounding
    assert jnp.allclose(out, ref, atol=1e-3, rtol=1e-3), "mismatch vs reference"

    print("KERNEL_OK")
</pallas_src>

<mosaic_0001>
module attributes {stable_mosaic.version = 11 : i64} {
  func.func @fused_mha_kernel(%arg0: i32, %arg1: i32, %arg2: memref<1x16x32xf32, #tpu.memory_space<vmem>>, %arg3: memref<1x3x32x8xf32, #tpu.memory_space<vmem>>, %arg4: memref<1x3x1x8xf32, #tpu.memory_space<vmem>>, %arg5: memref<1x1x16x8xf32, #tpu.memory_space<vmem>>, %arg6: memref<16x8xf32, #tpu.memory_space<vmem>>, %arg7: memref<16x8xf32, #tpu.memory_space<vmem>>, %arg8: memref<16x8xf32, #tpu.memory_space<vmem>>) attributes {dimension_semantics = [#tpu.dimension_semantics<parallel>, #tpu.dimension_semantics<parallel>], iteration_bounds = array<i64: 2, 4>, scalar_prefetch = 0 : i64, scratch_operands = 3 : i64, tpu.core_type = #tpu.core_type<tc>, window_params = [{transform_indices = @transform_0, window_bounds = array<i64: 1, 16, 32>}, {transform_indices = @transform_1, window_bounds = array<i64: 1, 3, 32, 8>}, {transform_indices = @transform_2, window_bounds = array<i64: 1, 3, 1, 8>}, {transform_indices = @transform_3, window_bounds = array<i64: 1, 1, 16, 8>}]} {
    %c0 = arith.constant 0 : index
    %c0_0 = arith.constant 0 : index
    %c0_1 = arith.constant 0 : index
    %0 = vector.load %arg2[%c0, %c0_0, %c0_1] : memref<1x16x32xf32, #tpu.memory_space<vmem>>, vector<1x16x32xf32>
    %1 = vector.shape_cast %0 : vector<1x16x32xf32> to vector<16x32xf32>
    %c0_2 = arith.constant 0 : index
    %c0_3 = arith.constant 0 : index
    %c0_4 = arith.constant 0 : index
    %c0_5 = arith.constant 0 : index
    %2 = vector.load %arg3[%c0_2, %c0_3, %c0_4, %c0_5] : memref<1x3x32x8xf32, #tpu.memory_space<vmem>>, vector<1x1x32x8xf32>
    %3 = vector.shape_cast %2 : vector<1x1x32x8xf32> to vector<32x8xf32>
    %cst = arith.constant dense<0.000000e+00> : vector<16x8xf32>
    %4 = tpu.matmul %1, %3, %cst {dimension_numbers = #tpu.dot_dimension_numbers<[1], [0], [0], [1], [0, 0, 1, 1], [], []>} : vector<16x32xf32>, vector<32x8xf32>, vector<16x8xf32> -> vector<16x8xf32>
    %c0_6 = arith.constant 0 : index
    %c0_7 = arith.constant 0 : index
    %c0_8 = arith.constant 0 : index
    %c0_9 = arith.constant 0 : index
    %5 = vector.load %arg4[%c0_6, %c0_7, %c0_8, %c0_9] : memref<1x3x1x8xf32, #tpu.memory_space<vmem>>, vector<1x1x1x8xf32>
    %6 = vector.shape_cast %5 : vector<1x1x1x8xf32> to vector<1x8xf32>
    %7 = vector.broadcast %6 : vector<1x8xf32> to vector<16x8xf32>
    %8 = arith.addf %4, %7 : vector<16x8xf32>
    %c0_10 = arith.constant 0 : index
    %c0_11 = arith.constant 0 : index
    %9 = vector.load %arg6[%c0_10, %c0_11] : memref<16x8xf32, #tpu.memory_space<vmem>>, vector<16x8xf32>
    tpu.vector_store %arg6[%c0_10, %c0_11], %8 {strides = array<i32>} : memref<16x8xf32, #tpu.memory_space<vmem>>, vector<16x8xf32>,
    %c0_12 = arith.constant 0 : index
    %c1 = arith.constant 1 : index
    %c0_13 = arith.constant 0 : index
    %c0_14 = arith.constant 0 : index
    %10 = vector.load %arg3[%c0_12, %c1, %c0_13, %c0_14] : memref<1x3x32x8xf32, #tpu.memory_space<vmem>>, vector<1x1x32x8xf32>
    %11 = vector.shape_cast %10 : vector<1x1x32x8xf32> to vector<32x8xf32>
    %cst_15 = arith.constant dense<0.000000e+00> : vector<16x8xf32>
    %12 = tpu.matmul %1, %11, %cst_15 {dimension_numbers = #tpu.dot_dimension_numbers<[1], [0], [0], [1], [0, 0, 1, 1], [], []>} : vector<16x32xf32>, vector<32x8xf32>, vector<16x8xf32> -> vector<16x8xf32>
    %c0_16 = arith.constant 0 : index
    %c1_17 = arith.constant 1 : index
    %c0_18 = arith.constant 0 : index
    %c0_19 = arith.constant 0 : index
    %13 = vector.load %arg4[%c0_16, %c1_17, %c0_18, %c0_19] : memref<1x3x1x8xf32, #tpu.memory_space<vmem>>, vector<1x1x1x8xf32>
    %14 = vector.shape_cast %13 : vector<1x1x1x8xf32> to vector<1x8xf32>
    %15 = vector.broadcast %14 : vector<1x8xf32> to vector<16x8xf32>
    %16 = arith.addf %12, %15 : vector<16x8xf32>
    %c0_20 = arith.constant 0 : index
    %c0_21 = arith.constant 0 : index
    %17 = vector.load %arg7[%c0_20, %c0_21] : memref<16x8xf32, #tpu.memory_space<vmem>>, vector<16x8xf32>
    tpu.vector_store %arg7[%c0_20, %c0_21], %16 {strides = array<i32>} : memref<16x8xf32, #tpu.memory_space<vmem>>, vector<16x8xf32>,
    %c0_22 = arith.constant 0 : index
    %c2 = arith.constant 2 : index
    %c0_23 = arith.constant 0 : index
    %c0_24 = arith.constant 0 : index
    %18 = vector.load %arg3[%c0_22, %c2, %c0_23, %c0_24] : memref<1x3x32x8xf32, #tpu.memory_space<vmem>>, vector<1x1x32x8xf32>
    %19 = vector.shape_cast %18 : vector<1x1x32x8xf32> to vector<32x8xf32>
    %cst_25 = arith.constant dense<0.000000e+00> : vector<16x8xf32>
    %20 = tpu.matmul %1, %19, %cst_25 {dimension_numbers = #tpu.dot_dimension_numbers<[1], [0], [0], [1], [0, 0, 1, 1], [], []>} : vector<16x32xf32>, vector<32x8xf32>, vector<16x8xf32> -> vector<16x8xf32>
    %c0_26 = arith.constant 0 : index
    %c2_27 = arith.constant 2 : index
    %c0_28 = arith.constant 0 : index
    %c0_29 = arith.constant 0 : index
    %21 = vector.load %arg4[%c0_26, %c2_27, %c0_28, %c0_29] : memref<1x3x1x8xf32, #tpu.memory_space<vmem>>, vector<1x1x1x8xf32>
    %22 = vector.shape_cast %21 : vector<1x1x1x8xf32> to vector<1x8xf32>
    %23 = vector.broadcast %22 : vector<1x8xf32> to vector<16x8xf32>
    %24 = arith.addf %20, %23 : vector<16x8xf32>
    %c0_30 = arith.constant 0 : index
    %c0_31 = arith.constant 0 : index
    %25 = vector.load %arg8[%c0_30, %c0_31] : memref<16x8xf32, #tpu.memory_space<vmem>>, vector<16x8xf32>
    tpu.vector_store %arg8[%c0_30, %c0_31], %24 {strides = array<i32>} : memref<16x8xf32, #tpu.memory_space<vmem>>, vector<16x8xf32>,
    %26 = tpu.iota {dimensions = array<i32: 0>} : vector<16x16xi32>
    %27 = tpu.iota {dimensions = array<i32: 1>} : vector<16x16xi32>
    %28 = arith.cmpi sle, %27, %26 : vector<16x16xi32>
    %c0_i32 = arith.constant 0 : i32
    %c1_i32 = arith.constant 1 : i32
    %29 = arith.muli %c0_i32, %c1_i32 : i32
    %c0_i32_32 = arith.constant 0 : i32
    %30 = arith.addi %c0_i32_32, %29 : i32
    %c16_i32 = arith.constant 16 : i32
    %31 = arith.muli %30, %c16_i32 : i32
    %32 = tpu.assume_multiple %31, 16 : i32
    %33 = arith.index_cast %32 : i32 to index
    %c0_33 = arith.constant 0 : index
    %34 = vector.load %arg6[%33, %c0_33] : memref<16x8xf32, #tpu.memory_space<vmem>>, vector<16x8xf32>
    %cst_34 = arith.constant 0xFF800000 : f32
    %35 = vector.broadcast %cst_34 : f32 to vector<16x1xf32>
    %cst_35 = arith.constant 0.000000e+00 : f32
    %36 = vector.broadcast %cst_35 : f32 to vector<16x1xf32>
    %cst_36 = arith.constant 0.000000e+00 : f32
    %37 = vector.broadcast %cst_36 : f32 to vector<16x8xf32>
    %c0_i32_37 = arith.constant 0 : i32
    %38 = arith.subi %30, %c0_i32_37 : i32
    %39 = arith.addi %c0_i32_37, %38 : i32
    %c1_i32_38 = arith.constant 1 : i32
    %40:3 = scf.for %arg9 = %c0_i32_37 to %39 step %c1_i32_38 iter_args(%arg10 = %35, %arg11 = %36, %arg12 = %37) -> (vector<16x1xf32>, vector<16x1xf32>, vector<16x8xf32>)  : i32 {
      %c16_i32_51 = arith.constant 16 : i32
      %72 = arith.muli %arg9, %c16_i32_51 : i32
      %73 = tpu.assume_multiple %72, 16 : i32
      %74 = arith.index_cast %73 : i32 to index
      %c0_52 = arith.constant 0 : index
      %75 = vector.load %arg7[%74, %c0_52] : memref<16x8xf32, #tpu.memory_space<vmem>>, vector<16x8xf32>
      %76 = arith.index_cast %73 : i32 to index
      %c0_53 = arith.constant 0 : index
      %77 = vector.load %arg8[%76, %c0_53] : memref<16x8xf32, #tpu.memory_space<vmem>>, vector<16x8xf32>
      %cst_54 = arith.constant dense<0.000000e+00> : vector<16x16xf32>
      %78 = tpu.matmul %34, %75, %cst_54 {dimension_numbers = #tpu.dot_dimension_numbers<[1], [1], [0], [0], [0, 0, 1, 0], [], []>} : vector<16x8xf32>, vector<16x8xf32>, vector<16x16xf32> -> vector<16x16xf32>
      %cst_55 = arith.constant dense<0xFF800000> : vector<16xf32>
      %79 = vector.multi_reduction <maximumf>, %78, %cst_55 [1] : vector<16x16xf32> to vector<16xf32>
      %80 = vector.shape_cast %79 : vector<16xf32> to vector<16x1xf32>
      %81 = arith.maximumf %arg10, %80 : vector<16x1xf32>
      %82 = arith.subf %arg10, %81 : vector<16x1xf32>
      %83 = math.exp %82 : vector<16x1xf32>
      %84 = vector.broadcast %81 : vector<16x1xf32> to vector<16x16xf32>
      %85 = arith.subf %78, %84 : vector<16x16xf32>
      %86 = math.exp %85 : vector<16x16xf32>
      %87 = arith.mulf %83, %arg11 : vector<16x1xf32>
      %cst_56 = arith.constant dense<0.000000e+00> : vector<16xf32>
      %88 = vector.multi_reduction <add>, %86, %cst_56 [1] : vector<16x16xf32> to vector<16xf32>
      %89 = vector.shape_cast %88 : vector<16xf32> to vector<16x1xf32>
      %90 = arith.addf %87, %89 : vector<16x1xf32>
      %91 = vector.broadcast %83 : vector<16x1xf32> to vector<16x8xf32>
      %92 = arith.mulf %91, %arg12 : vector<16x8xf32>
      %cst_57 = arith.constant dense<0.000000e+00> : vector<16x8xf32>
      %93 = tpu.matmul %86, %77, %cst_57 {dimension_numbers = #tpu.dot_dimension_numbers<[1], [0], [0], [1], [0, 0, 1, 1], [], []>} : vector<16x16xf32>, vector<16x8xf32>, vector<16x8xf32> -> vector<16x8xf32>
      %94 = arith.addf %92, %93 : vector<16x8xf32>
      scf.yield %81, %90, %94 : vector<16x1xf32>, vector<16x1xf32>, vector<16x8xf32>
    }
    %c16_i32_39 = arith.constant 16 : i32
    %41 = arith.muli %30, %c16_i32_39 : i32
    %42 = tpu.assume_multiple %41, 16 : i32
    %43 = arith.index_cast %42 : i32 to index
    %c0_40 = arith.constant 0 : index
    %44 = vector.load %arg7[%43, %c0_40] : memref<16x8xf32, #tpu.memory_space<vmem>>, vector<16x8xf32>
    %45 = arith.index_cast %42 : i32 to index
    %c0_41 = arith.constant 0 : index
    %46 = vector.load %arg8[%45, %c0_41] : memref<16x8xf32, #tpu.memory_space<vmem>>, vector<16x8xf32>
    %cst_42 = arith.constant dense<0.000000e+00> : vector<16x16xf32>
    %47 = tpu.matmul %34, %44, %cst_42 {dimension_numbers = #tpu.dot_dimension_numbers<[1], [1], [0], [0], [0, 0, 1, 0], [], []>} : vector<16x8xf32>, vector<16x8xf32>, vector<16x16xf32> -> vector<16x16xf32>
    %cst_43 = arith.constant 0xFF800000 : f32
    %48 = vector.broadcast %cst_43 : f32 to vector<16x16xf32>
    %49 = arith.select %28, %47, %48 : vector<16x16xi1>, vector<16x16xf32>
    %cst_44 = arith.constant dense<0xFF800000> : vector<16xf32>
    %50 = vector.multi_reduction <maximumf>, %49, %cst_44 [1] : vector<16x16xf32> to vector<16xf32>
    %51 = vector.shape_cast %50 : vector<16xf32> to vector<16x1xf32>
    %52 = arith.maximumf %40#0, %51 : vector<16x1xf32>
    %53 = arith.subf %40#0, %52 : vector<16x1xf32>
    %54 = math.exp %53 : vector<16x1xf32>
    %55 = vector.broadcast %52 : vector<16x1xf32> to vector<16x16xf32>
    %56 = arith.subf %49, %55 : vector<16x16xf32>
    %57 = math.exp %56 : vector<16x16xf32>
    %58 = arith.mulf %54, %40#1 : vector<16x1xf32>
    %cst_45 = arith.constant dense<0.000000e+00> : vector<16xf32>
    %59 = vector.multi_reduction <add>, %57, %cst_45 [1] : vector<16x16xf32> to vector<16xf32>
    %60 = vector.shape_cast %59 : vector<16xf32> to vector<16x1xf32>
    %61 = arith.addf %58, %60 : vector<16x1xf32>
    %62 = vector.broadcast %54 : vector<16x1xf32> to vector<16x8xf32>
    %63 = arith.mulf %62, %40#2 : vector<16x8xf32>
    %cst_46 = arith.constant dense<0.000000e+00> : vector<16x8xf32>
    %64 = tpu.matmul %57, %46, %cst_46 {dimension_numbers = #tpu.dot_dimension_numbers<[1], [0], [0], [1], [0, 0, 1, 1], [], []>} : vector<16x16xf32>, vector<16x8xf32>, vector<16x8xf32> -> vector<16x8xf32>
    %65 = arith.addf %63, %64 : vector<16x8xf32>
    %66 = vector.broadcast %61 : vector<16x1xf32> to vector<16x8xf32>
    %67 = arith.divf %65, %66 : vector<16x8xf32>
    %c0_47 = arith.constant 0 : index
    %c0_48 = arith.constant 0 : index
    %68 = arith.index_cast %32 : i32 to index
    %c0_49 = arith.constant 0 : index
    %69 = vector.load %arg5[%c0_47, %c0_48, %68, %c0_49] : memref<1x1x16x8xf32, #tpu.memory_space<vmem>>, vector<1x1x16x8xf32>
    %70 = vector.shape_cast %69 : vector<1x1x16x8xf32> to vector<16x8xf32>
    %71 = vector.shape_cast %67 : vector<16x8xf32> to vector<1x1x16x8xf32>
    tpu.vector_store %arg5[%c0_47, %c0_48, %68, %c0_49], %71 {strides = array<i32>} : memref<1x1x16x8xf32, #tpu.memory_space<vmem>>, vector<1x1x16x8xf32>,
    %c1_i32_50 = arith.constant 1 : i32
    return
  }
  func.func @transform_0(%arg0: i32, %arg1: i32) -> (i32, i32, i32) {
    %c0_i32 = arith.constant 0 : i32
    %c0_i32_0 = arith.constant 0 : i32
    %c0_i32_1 = arith.constant 0 : i32
    return %arg0, %c0_i32, %c0_i32_0 : i32, i32, i32
  }
  func.func @transform_1(%arg0: i32, %arg1: i32) -> (i32, i32, i32, i32) {
    %c0_i32 = arith.constant 0 : i32
    %c0_i32_0 = arith.constant 0 : i32
    %c0_i32_1 = arith.constant 0 : i32
    %c0_i32_2 = arith.constant 0 : i32
    return %arg1, %c0_i32, %c0_i32_0, %c0_i32_1 : i32, i32, i32, i32
  }
  func.func @transform_2(%arg0: i32, %arg1: i32) -> (i32, i32, i32, i32) {
    %c0_i32 = arith.constant 0 : i32
    %c0_i32_0 = arith.constant 0 : i32
    %c0_i32_1 = arith.constant 0 : i32
    %c0_i32_2 = arith.constant 0 : i32
    return %arg1, %c0_i32, %c0_i32_0, %c0_i32_1 : i32, i32, i32, i32
  }
  func.func @transform_3(%arg0: i32, %arg1: i32) -> (i32, i32, i32, i32) {
    %c0_i32 = arith.constant 0 : i32
    %c0_i32_0 = arith.constant 0 : i32
    %c0_i32_1 = arith.constant 0 : i32
    return %arg0, %arg1, %c0_i32, %c0_i32_0 : i32, i32, i32, i32
  }
}

</mosaic_0001>

<bundles_post_ra>
// kernel: multihead_attention.1
= control target key start
LH: loop header
LB: loop body
LE: loop exit
PB: predicated region body
PF: predicated region fallthrough
CT: control target
= control target key end

     0   :  { %s1098_s12 = smov 0   ;;  %s1100_s13 = smov 0   ;;  %s1201_s0 = inlined_call_operand.vmem [shape: f32[2,16,32], index: 0, kind: input, shape index: {}]   ;;  %s1202_s1 = inlined_call_operand.vmem [shape: f32[4,3,32,8], index: 1, kind: input, shape index: {}]   ;;  %s1203_s2 = inlined_call_operand.vmem [shape: f32[4,3,1,8], index: 2, kind: input, shape index: {}]   ;;  %s1204_s3 = inlined_call_operand.vmem [shape: f32[2,4,16,8], index: 3, kind: output, shape index: {}]  }
   0x1   :  { %s1102_s14 = smov 0   ;;  %s1104_s15 = smov 0  }
   0x2   :  { %s1106_s16 = smov 0  }
   0x3 LB: > { %s22_s17 = sadd.s32 1, %s1068_s14  ;;  %s25_s18 = sadd.s32 1, %s1072_s15  ;;  %s1076_s16 = sphi %s1106_s16, %s13_s16   ;;  %s1072_s15 = sphi %s1104_s15, %s1208_s15   ;;  %s1068_s14 = sphi %s1102_s14, %s1207_s14   ;;  %s1064_s13 = sphi %s1100_s13, %s1206_s13   ;;  %s1060_s12 = sphi %s1098_s12, %s1205_s12  }
   0x4   : > { %p23_p0 = scmp.ge.s32.totalorder %s22_s17, 4  ;;  %p842_p1 = scmp.ge.s32.totalorder %s1076_s16, 1 }
   0x5   : > { %p170_p2 = scmp.lt.s32.totalorder %s1076_s16, 9 }
   0x6   : > { %s1210_s17 = smov (%p23_p0, %s22_s17), 0  ;;  %s1212_s18 = smov (!%p23_p0, %s25_s18), %s1072_s15 }
   0x7   : > { %p171_p3 = pnand %p842_p1, %p170_p2  ;;  %p27_p4 = scmp.ge.s32.totalorder %s1212_s18, 2 }
   0x8   : > { %p212_p5 = scmp.lt.s32.totalorder (!%p171_p3), %s1060_s12, 3  ;;  %p207_p6 = scmp.lt.s32.totalorder (!%p171_p3), %s1064_s13, 1  ;;  %vm243_vm0 = vcmask (!%p171_p3), 261120   ;;  %vm325_vm1 = vcmask (!%p171_p3), 64512   ;;  %v508_v40 = vlaneseq (!%p171_p3)  ;;  %vm610_vm4 = vcmask (!%p171_p3), 130048  }
   0x9   : > { %s1214_s18 = smov (%p27_p4, %s1212_s18), 0  ;;  %174 = sbr.rel (%p171_p3) target bundleno = 858 (0x35a), region = 32 }
   0xa   : > { %vm975_vm2 = vmpackc.low (!%p171_p3), %vm325_vm1, %vm325_vm1  ;;  %v509_v41 = vshrl.u32 (!%p171_p3), %v508_v40, 7  ;;  %v512_v42 = vand.u32 (!%p171_p3), 127, %v508_v40 }
   0xc   : > { %v510_v43 = vadd.s32 (!%p171_p3), 8, %v509_v41  ;;  %vm513_vm3 = vcmp.le.s32.totalorder (!%p171_p3), %v512_v42, %v509_v41 }
   0xe   : > { %vm514_vm5 = vcmp.le.s32.totalorder (!%p171_p3), %v512_v42, %v510_v43 }
  0x10   : > { %s1216_s12 = smov (!%p212_p5, %s1060_s12), 3  ;;  %s1218_s13 = smov (!%p207_p6, %s1064_s13), 1 }
  0x11   : > { %s984_s19 = smul.u32 96, %s1216_s12  ;;  %s846_s20 = sshll.u32 %s1216_s12, 1 }
  0x12   : > { %s876_s21 = sshll.u32 %s1218_s13, 4  ;;  %s847_s22 = sshll.u32 %s1218_s13, 3 }
  0x13   : > { %s1135_s25 = scalar_lea.vmem %s1202_s1, %s984_s19  ;;  %s211_s28 = scalar_lea.vmem %s1201_s0, %s876_s21 }
  0x14   : > { %v852_v0 = vld [vmem:[%s1135_s25 + $0x20] sm:$0xff]  ;;  %v853_v1 = vld [vmem:[%s1135_s25 + $0x28] sm:$0xff]  ;;  %v854_v2 = vld [vmem:[%s1135_s25 + $0x30] sm:$0xff]  ;;  %s1143_s29 = sadd.s32 %s847_s22, %s846_s20  ;;  %s985_s30 = smul.u32 3, %s1216_s12 }
  0x15   : > { %v958_v3 = vpack.c.bf16 %v853_v1, %v852_v0  ;;  %v855_v4 = vld [vmem:[%s1135_s25 + $0x38] sm:$0xff]  ;;  %v230_v5 = vld [vmem:[%s211_s28] sm:$0xff]  ;;  %v233_v8 = vld [vmem:[%s1135_s25 + $0x8] sm:$0xff]  ;;  %s848_s7 = sshll.u32 %s1143_s29, 3 }
  0x16   : > { %v232_v6 = vld [vmem:[%s1135_s25] sm:$0xff]  ;;  %v962_v7 = vpack.c.bf16 %v855_v4, %v854_v2  ;;  %922 = vmatprep.mubr.msk.f32.mxu1 %vm243_vm0, %v230_v5  ;;  %v234_v9 = vld [vmem:[%s1135_s25 + $0x10] sm:$0xff]  ;;  %911 = vmatprep.mubr.msk.f32.mxu0 %vm243_vm0, %v230_v5  ;;  %v235_v11 = vld [vmem:[%s1135_s25 + $0x18] sm:$0xff]  ;;  %s220_s6 = scalar_lea.vmem %s1203_s2, %s985_s30  ;;  %s229_s10 = scalar_lea.vmem %s1204_s3, %s848_s7 }
  0x17   : > { %959 = vmatprep.subr.bf16.mxu1 %v958_v3  ;;  %v950_v10 = vpack.c.bf16 %v233_v8, %v232_v6  ;;  %v954_v12 = vpack.c.bf16 %v235_v11, %v234_v9  ;;  %v231_v13 = vld [vmem:[%s211_s28 + $0x8] sm:$0xff]  ;;  %v860_v14 = vld [vmem:[%s1135_s25 + $0x40] sm:$0xff]  ;;  %v862_v16 = vld [vmem:[%s1135_s25 + $0x50] sm:$0xff] }
  0x18   : > { %961 = vmatpush3.bf16.msra.mxu1 %v958_v3  ;;  %v861_v15 = vld [vmem:[%s1135_s25 + $0x48] sm:$0xff]  ;;  %v863_v18 = vld [vmem:[%s1135_s25 + $0x58] sm:$0xff]  ;;  %v857_v20 = vld [vmem:[%s220_s6 + $0x1] ss:$0 sm:$0xff] }
  0x19   : > { %963 = vmatprep.subr.bf16.mxu1 %v962_v7  ;;  %951 = vmatprep.subr.bf16.mxu0 %v950_v10  ;;  %v966_v17 = vpack.c.bf16 %v861_v15, %v860_v14  ;;  %v970_v19 = vpack.c.bf16 %v863_v18, %v862_v16  ;;  %v849_v22 = vld [vmem:[%s220_s6] ss:$0 sm:$0xff]  ;;  %v865_v35 = vld [vmem:[%s220_s6 + $0x2] ss:$0 sm:$0xff] }
  0x1a   : > { %953 = vmatpush3.bf16.msra.mxu0 %v950_v10 }
  0x1b   : > { %955 = vmatprep.subr.bf16.mxu0 %v954_v12 }
  0x1c   : > { %965 = vmatpush3.bf16.msra.mxu1 %v962_v7 }
  0x1e   : > { %957 = vmatpush3.bf16.msra.mxu0 %v954_v12 }
  0x1f   : > { %923 = vmatmul.mubr.msk.f32.vlgmr.msra.gmra.mrb[0].mxu1 %vm243_vm0, %v231_v13  ;;  %967 = vmatprep.subr.bf16.mxu0 %v966_v17 }
  0x21   : > { %912 = vmatmul.mubr.msk.f32.vlgmr.msra.gmra.mrb[0].mxu0 %vm243_vm0, %v231_v13 }
  0x22   : > { %933 = vmatprep.mubr.msk.f32.mxu0 %vm243_vm0, %v230_v5  ;;  %969 = vmatpush3.bf16.msra.mxu0 %v966_v17 }
  0x23   : > { %971 = vmatprep.subr.bf16.mxu0 %v970_v19 }
  0x26   : > { %973 = vmatpush3.bf16.msra.mxu0 %v970_v19 }
  0x29   : > { %934 = vmatmul.mubr.msk.f32.vlgmr.msra.gmra.mrb[2].mxu0 %vm243_vm0, %v231_v13 }
  0xf2   : > { %v924_v21 = vpop.f32.mrb[0].mxu1 }
  0xf3   : > { %v413_v23 = vadd.f32 %v924_v21, %v857_v20  ;;  %v407_v24 = vpop.f32.mrb[1].mxu1 }
  0xf4   : > { %v408_v25 = vadd.f32 %v857_v20, %v407_v24  ;;  %v913_v26 = vpop.f32.mrb[0].mxu0 }
  0xf5   : > { %417 = vst.msk [vmem:[#allocation3 + $0x8] sm:$0xff] %vm325_vm1, %v413_v23  ;;  %v322_v27 = vadd.f32 %v913_v26, %v849_v22  ;;  %v316_v28 = vpop.f32.mrb[1].mxu0 }
  0xf6   : > { %416 = vst.msk [vmem:[#allocation3] sm:$0xff] %vm325_vm1, %v408_v25  ;;  %v317_v29 = vadd.f32 %v849_v22, %v316_v28 }
  0xf7   : > { %327 = vst.msk [vmem:[#allocation2 + $0x8] sm:$0xff] %vm325_vm1, %v322_v27 }
  0xf8   : > { %326 = vst.msk [vmem:[#allocation2] sm:$0xff] %vm325_vm1, %v317_v29 }
  0xfc   : > { %v518_v30 = vld [vmem:[#allocation3 + $0x8] sm:$0xff]  ;;  %v935_v36 = vpop.f32.mrb[2].mxu0 }
  0xfd   : > { %v517_v31 = vld [vmem:[#allocation3] sm:$0xff]  ;;  %v503_v37 = vadd.f32 %v935_v36, %v865_v35  ;;  %v497_v38 = vpop.f32.mrb[3].mxu0 }
  0xfe   : > { %v974_v32 = vpack.c.bf16 %v518_v30, %v517_v31  ;;  %v516_v34 = vld [vmem:[#allocation2 + $0x8] sm:$0xff]  ;;  %v498_v39 = vadd.f32 %v865_v35, %v497_v38 }
  0xff   : > { %v515_v33 = vld [vmem:[#allocation2] sm:$0xff]  ;;  %507 = vst.msk [vmem:[#allocation4 + $0x8] sm:$0xff] %vm325_vm1, %v503_v37 }
 0x100   : > { %976 = vmatprep.subr.msk.bf16.mxu1 %vm975_vm2, %v974_v32  ;;  %940 = vmatprep.mubr.msk.f32.mxu1 %vm325_vm1, %v515_v33  ;;  %506 = vst.msk [vmem:[#allocation4] sm:$0xff] %vm325_vm1, %v498_v39 }
 0x101   : > { %979 = vmatpush3.bf16.xpose.msk.msra.mxu1 %vm975_vm2, %v974_v32 }
 0x106   : > { %v520_v51 = vld [vmem:[#allocation4 + $0x8] sm:$0xff] }
 0x107   : > { %v519_v50 = vld [vmem:[#allocation4] sm:$0xff] }
 0x108   : > { %941 = vmatmul.mubr.msk.f32.vlgmr.msra.gmra.mrb[2].mxu1 %vm325_vm1, %v516_v34  ;;  %v980_v52 = vpack.c.bf16 %v520_v51, %v519_v50 }
 0x10a   : > { %981 = vmatprep.subr.bf16.mxu0 %v980_v52 }
 0x10b   : > { %983 = vmatpush3.bf16.msra.mxu0 %v980_v52 }
 0x1db   : > { %v942_v44 = vpop.f32.mrb[2].mxu1 }
 0x1dc   : > { %v599_v45 = vpop.f32.mrb[3].mxu1  ;;  %v609_v48 = vsel %vm514_vm5, %v942_v44, -inf }
 0x1dd   : > { %v608_v46 = vsel %vm513_vm3, %v599_v45, -inf  ;;  %v614_v49 = vsel %vm610_vm4, %v609_v48, -inf }
 0x1de   : > { %v611_v47 = vsel %vm610_vm4, %v608_v46, -inf }
 0x1df   : > { %612 = vmax.xlane.f32.xlu0 %v611_v47 }
 0x1e3   : > { %615 = vmax.xlane.f32.xlu0 %v614_v49 }
 0x26c   : > { %v613_v53 = vpop.xlane.xlu0 %612 }
 0x26d   : > { %v623_v54 = vsub.f32 %v608_v46, %v613_v53  ;;  %v617_v0 = vsub.f32 -inf, %v613_v53 }
 0x26f   : > { %v625_v55 = vmul.f32 1.442695, %v623_v54  ;;  %v619_v2 = vmul.f32 1.442695, %v617_v0 }
 0x270   : > { %v616_v56 = vpop.xlane.xlu0 %615 }
 0x271   : > { %v624_v57 = vsub.f32 %v609_v48, %v616_v56  ;;  %1026 = vpow2.f32 %v625_v55  ;;  %v618_v63 = vsub.f32 -inf, %v616_v56 }
 0x273   : > { %v627_v58 = vmul.f32 1.442695, %v624_v57  ;;  %v621_v1 = vmul.f32 1.442695, %v618_v63 }
 0x275   : > { %1028 = vpow2.f32 %v627_v58 }
 0x276   : > { %1030 = vpow2.f32 %v621_v1 }
 0x277   : > { %1032 = vpow2.f32 %v619_v2 }
 0x27b   : > { %v1027_v59 = vpop.eup %1026 }
 0x27c   : > { %947 = vmatprep.mubr.msk.f32.mxu0 %vm610_vm4, %v1027_v59  ;;  %v631_v60 = vsel %vm610_vm4, %v1027_v59, 0.0 }
 0x27d   : > { %632 = vadd.xlane.f32.xlu1 %v631_v60 }
 0x27f   : > { %v1029_v61 = vpop.eup %1028 }
 0x280   : > { %948 = vmatmul.mubr.msk.f32.vlgmr.msra.gmra.mrb[4].mxu0 %vm610_vm4, %v1029_v61  ;;  %v634_v62 = vsel %vm610_vm4, %v1029_v61, 0.0  ;;  %v1031_v4 = vpop.eup %1030 }
 0x281   : > { %635 = vadd.xlane.f32.xlu1 %v634_v62  ;;  %v1033_v5 = vpop.eup %1032  ;;  %v630_v7 = vmul.f32 0.0, %v1031_v4 }
 0x282   : > { %v629_v8 = vmul.f32 0.0, %v1033_v5 }
 0x30a   : > { %v633_v3 = vpop.xlane.xlu1 %632 }
 0x30b   : > { %v637_v10 = vadd.f32 %v633_v3, %v629_v8 }
 0x30e   : > { %v636_v6 = vpop.xlane.xlu1 %635 }
 0x30f   : > { %v638_v9 = vadd.f32 %v636_v6, %v630_v7 }
 0x311   : > { %1034 = vrcp.f32 %v638_v9 }
 0x312   : > { %1036 = vrcp.f32 %v637_v10 }
 0x31b   : > { %v1035_v14 = vpop.eup %1034 }
 0x31c   : > { %v1037_v16 = vpop.eup %1036 }
 0x353   : > { %v949_v11 = vpop.f32.mrb[4].mxu0 }
 0x354   : > { %v721_v12 = vadd.f32 %v949_v11, %v630_v7  ;;  %v711_v13 = vpop.f32.mrb[5].mxu0 }
 0x355   : > { %v720_v15 = vadd.f32 %v711_v13, %v629_v8 }
 0x356   : > { %v725_v17 = vmul.f32 %v1035_v14, %v721_v12 }
 0x357   : > { %v723_v18 = vmul.f32 %v1037_v16, %v720_v15 }
 0x358   : > { %727 = vst.msk [vmem:[%s229_s10 + $0x8] sm:$0xff] %vm325_vm1, %v725_v17 }
 0x359   : > { %726 = vst.msk [vmem:[%s229_s10] sm:$0xff] %vm325_vm1, %v723_v18 }
 0x35a PF: > { %s13_s16 = sadd.s32 1, %s1076_s16   ;;  %s1205_s12 = smov %s1068_s14 }
 0x35b   : > { %p10_p7 = scmp.ge.s32.totalorder %s13_s16, 10   ;;  %s1206_s13 = smov %s1072_s15 }
 0x35c   : > { %s1207_s14 = smov %s1210_s17  ;;  %s1208_s15 = smov %s1214_s18 }
 0x35d   :  { %12 = sbr.rel (!%p10_p7) target bundleno = 3 (0x3), region = 72 }

</bundles_post_ra>
